<compile_context>
chip_gen: v6e
topology: v6e:2x2x1
jax: 0.10.0
libtpu: 0.0.40
codegen_flags: <defaults>
</compile_context>

<pallas_src>
import functools

import jax
import jax.numpy as jnp
from jax.experimental import pallas as pl
from jax.experimental.pallas import tpu as pltpu


# ---------------------------------------------------------------------------
# Kernels
# ---------------------------------------------------------------------------

def _bn_prelu_kernel(x_ref, scale_ref, shift_ref, alpha_ref, o_ref):
    """Flattened (rows, lanes) BN + PReLU.  rows = N*C, lanes = padded H*W."""
    x = x_ref[...].astype(jnp.float32)               # (t_r, t_l)
    y = x * scale_ref[...] + shift_ref[...]          # scale/shift: (t_r, 1) f32
    a = alpha_ref[...]                                # (t_r, 1) f32
    o_ref[...] = jnp.where(y > 0.0, y, a * y).astype(o_ref.dtype)


def _bn_prelu_conv_kernel(x_ref, scale_ref, shift_ref, alpha_ref, w_ref, o_ref,
                          *, bt):
    """(B_t, Cin, t_hw) block: BN + PReLU then 1x1 conv as w @ p on the MXU."""
    w = w_ref[...]                                    # (Cout, Cin) f32
    scale = scale_ref[0]                              # (Cin, 1) f32
    shift = shift_ref[0]
    a = alpha_ref[0]
    for b in range(bt):                               # small, static unroll
        x = x_ref[b].astype(jnp.float32)              # (Cin, t_hw)
        y = x * scale + shift
        p = jnp.where(y > 0.0, y, a * y)
        o_ref[b] = jnp.dot(w, p,
                           preferred_element_type=jnp.float32).astype(o_ref.dtype)


# ---------------------------------------------------------------------------
# Tiling helpers
# ---------------------------------------------------------------------------

def _vmem_limit_bytes():
    try:
        cap = int(getattr(pltpu.get_tpu_info(), "vmem_capacity_bytes", 128 << 20))
    except Exception:
        cap = 128 << 20
    # Half of physical VMEM: 64 MiB on v5e/v6e, 32 MiB on v7x.
    return int(min(cap // 2, 64 << 20))


def _lane_candidates(L):
    cands = [t for t in range(128, L + 1, 128) if L % t == 0]
    return cands if cands else [L]


def _pick_2d_tiles(R, L, in_bytes, out_bytes, budget):
    """(row tile, lane tile) for the flattened BN+PReLU path."""
    l_cands = _lane_candidates(L)
    if R % 8 == 0:
        r_cands = [t for t in range(8, R + 1, 8) if R % t == 0]
    else:
        r_cands = [R]   # full extent satisfies the sublane rule

    def fits(tr, tl):
        blk = tr * tl
        # double-buffered in + out blocks, plus f32 temporaries (y / result)
        return 2 * blk * (in_bytes + out_bytes) + 3 * blk * 4 <= budget

    tr = r_cands[0]
    for c in r_cands:
        if fits(c, l_cands[0]):
            tr = c
    tl = l_cands[0]
    for c in l_cands:
        if fits(tr, c):
            tl = c
    # Prefer >= 2 grid steps (v7x dual-TC sharding + pipeline double-buffer).
    if (R // tr) * (L // tl) < 2:
        smaller_l = [c for c in l_cands if c < tl]
        smaller_r = [c for c in r_cands if c < tr]
        if smaller_l:
            tl = smaller_l[-1]
        elif smaller_r:
            tr = smaller_r[-1]
    return tr, tl


def _pick_conv_tiles(N, Cin, Cout, L, in_bytes, out_bytes, budget):
    """(batch-per-block, lane tile) for the BN+PReLU+1x1-conv path."""
    l_cands = _lane_candidates(L)
    b_cands = [b for b in range(1, N + 1) if N % b == 0 and b <= 16]

    def fits(bt, tl):
        dma = 2 * bt * tl * (Cin * in_bytes + Cout * out_bytes)   # double-buffered
        tmp = (Cin + Cout) * tl * 4                               # f32 temporaries
        w = 2 * Cout * Cin * 4
        return dma + tmp + w <= budget

    tl = l_cands[0]
    for c in l_cands:
        if fits(1, c):
            tl = c

    bt = 1
    target_in_bytes = 1 << 19   # aim for >= ~512 KiB of input per grid step
    for b in b_cands:
        if not fits(b, tl):
            break
        if (N // b) * (L // tl) < 2 and (N // bt) * (L // tl) >= 2:
            break   # keep >= 2 grid steps when we already have them
        bt = b
        if b * tl * Cin * in_bytes >= target_in_bytes:
            break
    return bt, tl


# ---------------------------------------------------------------------------
# Wrapper
# ---------------------------------------------------------------------------

def _folded_bn(params, Cin):
    gamma = jnp.asarray(params["bn_gamma"], jnp.float32)
    beta = jnp.asarray(params["bn_beta"], jnp.float32)
    mean = jnp.asarray(params["bn_running_mean"], jnp.float32)
    var = jnp.asarray(params["bn_running_var"], jnp.float32)
    eps = params["bn_eps"]
    inv_std = 1.0 / jnp.sqrt(var + eps)
    scale = gamma * inv_std                                   # (Cin,)
    shift = beta - mean * gamma * inv_std                     # (Cin,)
    alpha = jnp.asarray(params["prelu_a"], jnp.float32).reshape(-1)
    if alpha.size == 1:
        alpha = jnp.broadcast_to(alpha, (Cin,))
    return scale, shift, alpha


def bottleneck_block(x, params):
    """x: (N, C_in, H, W) NCHW (PyTorch convention). Returns NCHW, x.dtype."""
    N, Cin, H, W = x.shape
    HW = H * W
    HW_pad = ((HW + 127) // 128) * 128                        # lane-align spatial
    out_dtype = x.dtype
    in_bytes = jnp.dtype(x.dtype).itemsize
    out_bytes = jnp.dtype(out_dtype).itemsize

    scale_c, shift_c, alpha_c = _folded_bn(params, Cin)

    vmem_limit = _vmem_limit_bytes()
    budget = int(0.8 * vmem_limit)
    cp = pltpu.CompilerParams(
        dimension_semantics=("parallel", "parallel"),
        vmem_limit_bytes=vmem_limit)

    conv_w = params.get("conv_w", None)

    if conv_w is None:
        # ---- BN + PReLU only: flatten batch & channel into the sublane axis.
        R = N * Cin
        xm = x.reshape(R, HW)
        if HW_pad != HW:
            xm = jnp.pad(xm, ((0, 0), (0, HW_pad - HW)))
        scale_r = jnp.tile(scale_c, N).reshape(R, 1)
        shift_r = jnp.tile(shift_c, N).reshape(R, 1)
        alpha_r = jnp.tile(alpha_c, N).reshape(R, 1)

        t_r, t_l = _pick_2d_tiles(R, HW_pad, in_bytes, out_bytes, budget)
        grid = (R // t_r, HW_pad // t_l)

        x_spec = pl.BlockSpec((t_r, t_l), lambda r, l: (r, l))
        vec_spec = pl.BlockSpec((t_r, 1), lambda r, l: (r, 0))
        out_spec = pl.BlockSpec((t_r, t_l), lambda r, l: (r, l))

        out = pl.pallas_call(
            _bn_prelu_kernel,
            out_shape=jax.ShapeDtypeStruct((R, HW_pad), out_dtype),
            grid=grid,
            in_specs=[x_spec, vec_spec, vec_spec, vec_spec],
            out_specs=out_spec,
            compiler_params=cp,
        )(xm, scale_r, shift_r, alpha_r)

        out = out[:, :HW] if HW_pad != HW else out
        return out.reshape(N, Cin, H, W)

    # ---- BN + PReLU + 1x1 conv (bias=False).
    Cout = conv_w.shape[0]
    wmat = jnp.asarray(conv_w, jnp.float32).reshape(Cout, Cin)
    xm = x.reshape(N, Cin, HW)
    if HW_pad != HW:
        xm = jnp.pad(xm, ((0, 0), (0, 0), (0, HW_pad - HW)))
    scale_v = scale_c.reshape(1, Cin, 1)
    shift_v = shift_c.reshape(1, Cin, 1)
    alpha_v = alpha_c.reshape(1, Cin, 1)

    bt, t_l = _pick_conv_tiles(N, Cin, Cout, HW_pad, in_bytes, out_bytes, budget)
    grid = (N // bt, HW_pad // t_l)

    x_spec = pl.BlockSpec((bt, Cin, t_l), lambda n, l: (n, 0, l))
    vec_spec = pl.BlockSpec((1, Cin, 1), lambda n, l: (0, 0, 0))
    w_spec = pl.BlockSpec((Cout, Cin), lambda n, l: (0, 0))
    out_spec = pl.BlockSpec((bt, Cout, t_l), lambda n, l: (n, 0, l))

    kern = functools.partial(_bn_prelu_conv_kernel, bt=bt)
    out = pl.pallas_call(
        kern,
        out_shape=jax.ShapeDtypeStruct((N, Cout, HW_pad), out_dtype),
        grid=grid,
        in_specs=[x_spec, vec_spec, vec_spec, vec_spec, w_spec],
        out_specs=out_spec,
        compiler_params=cp,
    )(xm, scale_v, shift_v, alpha_v, wmat)

    out = out[:, :, :HW] if HW_pad != HW else out
    return out.reshape(N, Cout, H, W)


# ---------------------------------------------------------------------------
# Pure-JAX reference (PyTorch eval-mode forward semantics)
# ---------------------------------------------------------------------------

def reference(x, params):
    gamma = params["bn_gamma"][None, :, None, None]
    beta = params["bn_beta"][None, :, None, None]
    mean = params["bn_running_mean"][None, :, None, None]
    var = params["bn_running_var"][None, :, None, None]
    eps = params["bn_eps"]
    y = (x - mean) / jnp.sqrt(var + eps) * gamma + beta
    a = jnp.asarray(params["prelu_a"]).reshape(-1)
    a = a[None, :, None, None] if a.size > 1 else a.reshape(())
    p = jnp.where(y > 0, y, a * y)
    conv_w = params.get("conv_w", None)
    if conv_w is None:
        return p
    Cout, Cin = conv_w.shape[0], conv_w.shape[1]
    return jnp.einsum("nchw,oc->nohw", p, conv_w.reshape(Cout, Cin))


if __name__ == "__main__":
    key = jax.random.PRNGKey(0)
    ks = jax.random.split(key, 6)
    N, Cin, H, W = 2, 4, 16, 16
    Cout = 8

    x = jax.random.normal(ks[0], (N, Cin, H, W), jnp.float32)
    params = {
        "bn_gamma": jax.random.uniform(ks[1], (Cin,), jnp.float32, 0.5, 1.5),
        "bn_beta": 0.1 * jax.random.normal(ks[2], (Cin,), jnp.float32),
        "bn_running_mean": 0.1 * jax.random.normal(ks[3], (Cin,), jnp.float32),
        "bn_running_var": jax.random.uniform(ks[4], (Cin,), jnp.float32, 0.5, 1.5),
        "bn_eps": 1e-5,
        "prelu_a": jnp.array(0.25, jnp.float32),           # nn.PReLU() default init
        "conv_w": 0.1 * jax.random.normal(ks[5], (Cout, Cin, 1, 1), jnp.float32),
    }

    # Case 1: in_planes != out_planes -> BN + PReLU + 1x1 conv
    out = jax.block_until_ready(bottleneck_block(x, params))
    ref = reference(x, params)
    assert out.shape == (N, Cout, H, W), out.shape
    assert out.dtype == x.dtype
    assert jnp.allclose(out, ref, atol=1e-4, rtol=1e-4)

    # Case 2: in_planes == out_planes -> conv disabled, BN + PReLU only
    params_id = dict(params)
    params_id.pop("conv_w")
    out2 = jax.block_until_ready(bottleneck_block(x, params_id))
    ref2 = reference(x, params_id)
    assert out2.shape == (N, Cin, H, W), out2.shape
    assert jnp.allclose(out2, ref2, atol=1e-4, rtol=1e-4)

    print("KERNEL_OK")
</pallas_src>

<mosaic_0001>
module attributes {stable_mosaic.version = 11 : i64} {
  func.func @_bn_prelu_conv_kernel(%arg0: i32, %arg1: i32, %arg2: memref<1x4x256xf32, #tpu.memory_space<vmem>>, %arg3: memref<1x4x1xf32, #tpu.memory_space<vmem>>, %arg4: memref<1x4x1xf32, #tpu.memory_space<vmem>>, %arg5: memref<1x4x1xf32, #tpu.memory_space<vmem>>, %arg6: memref<8x4xf32, #tpu.memory_space<vmem>>, %arg7: memref<1x8x256xf32, #tpu.memory_space<vmem>>) attributes {dimension_semantics = [#tpu.dimension_semantics<parallel>, #tpu.dimension_semantics<parallel>], iteration_bounds = array<i64: 2, 1>, scalar_prefetch = 0 : i64, scratch_operands = 0 : i64, tpu.core_type = #tpu.core_type<tc>, window_params = [{transform_indices = @transform_0, window_bounds = array<i64: 1, 4, 256>}, {pipeline_mode = #tpu.pipeline_mode<synchronous>, transform_indices = @transform_1, window_bounds = array<i64: 1, 4, 1>}, {pipeline_mode = #tpu.pipeline_mode<synchronous>, transform_indices = @transform_2, window_bounds = array<i64: 1, 4, 1>}, {pipeline_mode = #tpu.pipeline_mode<synchronous>, transform_indices = @transform_3, window_bounds = array<i64: 1, 4, 1>}, {pipeline_mode = #tpu.pipeline_mode<synchronous>, transform_indices = @transform_4, window_bounds = array<i64: 8, 4>}, {transform_indices = @transform_5, window_bounds = array<i64: 1, 8, 256>}]} {
    %c0 = arith.constant 0 : index
    %c0_0 = arith.constant 0 : index
    %0 = vector.load %arg6[%c0, %c0_0] : memref<8x4xf32, #tpu.memory_space<vmem>>, vector<8x4xf32>
    %c0_1 = arith.constant 0 : index
    %c0_2 = arith.constant 0 : index
    %c0_3 = arith.constant 0 : index
    %1 = vector.load %arg3[%c0_1, %c0_2, %c0_3] : memref<1x4x1xf32, #tpu.memory_space<vmem>>, vector<1x4x1xf32>
    %2 = vector.shape_cast %1 : vector<1x4x1xf32> to vector<4x1xf32>
    %c0_4 = arith.constant 0 : index
    %c0_5 = arith.constant 0 : index
    %c0_6 = arith.constant 0 : index
    %3 = vector.load %arg4[%c0_4, %c0_5, %c0_6] : memref<1x4x1xf32, #tpu.memory_space<vmem>>, vector<1x4x1xf32>
    %4 = vector.shape_cast %3 : vector<1x4x1xf32> to vector<4x1xf32>
    %c0_7 = arith.constant 0 : index
    %c0_8 = arith.constant 0 : index
    %c0_9 = arith.constant 0 : index
    %5 = vector.load %arg5[%c0_7, %c0_8, %c0_9] : memref<1x4x1xf32, #tpu.memory_space<vmem>>, vector<1x4x1xf32>
    %6 = vector.shape_cast %5 : vector<1x4x1xf32> to vector<4x1xf32>
    %c0_10 = arith.constant 0 : index
    %c0_11 = arith.constant 0 : index
    %c0_12 = arith.constant 0 : index
    %7 = vector.load %arg2[%c0_10, %c0_11, %c0_12] : memref<1x4x256xf32, #tpu.memory_space<vmem>>, vector<1x4x256xf32>
    %8 = vector.shape_cast %7 : vector<1x4x256xf32> to vector<4x256xf32>
    %9 = vector.broadcast %2 : vector<4x1xf32> to vector<4x256xf32>
    %10 = arith.mulf %8, %9 : vector<4x256xf32>
    %11 = vector.broadcast %4 : vector<4x1xf32> to vector<4x256xf32>
    %12 = arith.addf %10, %11 : vector<4x256xf32>
    %cst = arith.constant 0.000000e+00 : f32
    %13 = vector.broadcast %cst : f32 to vector<4x256xf32>
    %14 = arith.cmpf ogt, %12, %13 : vector<4x256xf32>
    %15 = vector.broadcast %6 : vector<4x1xf32> to vector<4x256xf32>
    %16 = arith.mulf %15, %12 : vector<4x256xf32>
    %17 = arith.select %14, %12, %16 : vector<4x256xi1>, vector<4x256xf32>
    %cst_13 = arith.constant dense<0.000000e+00> : vector<8x256xf32>
    %18 = tpu.matmul %0, %17, %cst_13 {dimension_numbers = #tpu.dot_dimension_numbers<[1], [0], [0], [1], [0, 0, 1, 1], [], []>} : vector<8x4xf32>, vector<4x256xf32>, vector<8x256xf32> -> vector<8x256xf32>
    %c0_14 = arith.constant 0 : index
    %c0_15 = arith.constant 0 : index
    %c0_16 = arith.constant 0 : index
    %19 = vector.load %arg7[%c0_14, %c0_15, %c0_16] : memref<1x8x256xf32, #tpu.memory_space<vmem>>, vector<1x8x256xf32>
    %20 = vector.shape_cast %19 : vector<1x8x256xf32> to vector<8x256xf32>
    %21 = vector.shape_cast %18 : vector<8x256xf32> to vector<1x8x256xf32>
    tpu.vector_store %arg7[%c0_14, %c0_15, %c0_16], %21 {strides = array<i32>} : memref<1x8x256xf32, #tpu.memory_space<vmem>>, vector<1x8x256xf32>,
    return
  }
  func.func @transform_0(%arg0: i32, %arg1: i32) -> (i32, i32, i32) {
    %c0_i32 = arith.constant 0 : i32
    %c0_i32_0 = arith.constant 0 : i32
    return %arg0, %c0_i32, %arg1 : i32, i32, i32
  }
  func.func @transform_1(%arg0: i32, %arg1: i32) -> (i32, i32, i32) {
    %c0_i32 = arith.constant 0 : i32
    %c0_i32_0 = arith.constant 0 : i32
    %c0_i32_1 = arith.constant 0 : i32
    %c0_i32_2 = arith.constant 0 : i32
    return %c0_i32, %c0_i32_0, %c0_i32_1 : i32, i32, i32
  }
  func.func @transform_2(%arg0: i32, %arg1: i32) -> (i32, i32, i32) {
    %c0_i32 = arith.constant 0 : i32
    %c0_i32_0 = arith.constant 0 : i32
    %c0_i32_1 = arith.constant 0 : i32
    %c0_i32_2 = arith.constant 0 : i32
    return %c0_i32, %c0_i32_0, %c0_i32_1 : i32, i32, i32
  }
  func.func @transform_3(%arg0: i32, %arg1: i32) -> (i32, i32, i32) {
    %c0_i32 = arith.constant 0 : i32
    %c0_i32_0 = arith.constant 0 : i32
    %c0_i32_1 = arith.constant 0 : i32
    %c0_i32_2 = arith.constant 0 : i32
    return %c0_i32, %c0_i32_0, %c0_i32_1 : i32, i32, i32
  }
  func.func @transform_4(%arg0: i32, %arg1: i32) -> (i32, i32) {
    %c0_i32 = arith.constant 0 : i32
    %c0_i32_0 = arith.constant 0 : i32
    %c0_i32_1 = arith.constant 0 : i32
    return %c0_i32, %c0_i32_0 : i32, i32
  }
  func.func @transform_5(%arg0: i32, %arg1: i32) -> (i32, i32, i32) {
    %c0_i32 = arith.constant 0 : i32
    %c0_i32_0 = arith.constant 0 : i32
    return %arg0, %c0_i32, %arg1 : i32, i32, i32
  }
}

</mosaic_0001>

<bundles_post_ra>
// kernel: tpu_custom_call.1
= control target key start
LH: loop header
LB: loop body
LE: loop exit
PB: predicated region body
PF: predicated region fallthrough
CT: control target
= control target key end

     0   :  { %10 = vsyncpa [#allocation3], 0  ;;  %s785_s0 = inlined_call_operand.vmem [shape: f32[2,4,256], index: 0, kind: input, shape index: {}]   ;;  %s786_s1 = inlined_call_operand.vmem [shape: f32[1,4,1], index: 1, kind: input, shape index: {}]   ;;  %s787_s2 = inlined_call_operand.vmem [shape: f32[1,4,1], index: 2, kind: input, shape index: {}]   ;;  %s788_s3 = inlined_call_operand.vmem [shape: f32[1,4,1], index: 3, kind: input, shape index: {}]   ;;  %s789_s4 = inlined_call_operand.vmem [shape: f32[8,4], index: 4, kind: input, shape index: {}]   ;;  %s790_s5 = inlined_call_operand.hbm [shape: f32[2,8,256], index: 5, kind: output, shape index: {}]  }
   0x1   :  { %12 = vsyncpa [#allocation3 + $0x1], 0  ;;  %s668_s18 = smov 0   ;;  %s670_s19 = smov 0  }
   0x2   :  { %s672_s20 = smov 0   ;;  %s674_s21 = smov 0  }
   0x3   :  { %s676_s22 = smov 0   ;;  %s678_s23 = smov 0  }
   0x4 LB: > { %s478_s24 = sadd.s32 4294967295, %s632_s23   ;;  %s479_s25 = sadd.s32 4294967294, %s632_s23   ;;  %s632_s23 = sphi %s678_s23, %s18_s23   ;;  %s628_s22 = sphi %s676_s22, %s797_s22   ;;  %s624_s21 = sphi %s674_s21, %s796_s21   ;;  %s620_s20 = sphi %s672_s20, %s795_s20   ;;  %s616_s19 = sphi %s670_s19, %s794_s19   ;;  %s612_s18 = sphi %s668_s18, %s793_s18  }
   0x5   : > { %s30_s26 = sadd.s32 1, %s628_s22  ;;  %s151_s27 = sadd.s32 1, %s620_s20 }
   0x6   : > { %p32_p0 = scmp.ge.s32.totalorder %s30_s26, 2  ;;  %p161_p1 = scmp.ne.s32.totalorder %s620_s20, %s616_s19 }
   0x7   : > { %p162_p2 = scmp.eq.s32.totalorder %s478_s24, 1  ;;  %p167_p3 = scmp.ne.s32.totalorder %s616_s19, %s612_s18 }
   0x8   : > { %s799_s26 = smov (%p32_p0, %s30_s26), 0  ;;  %p168_p5 = scmp.eq.s32.totalorder %s479_s25, 1 }
   0x9   : > { %p708_p4 = por %p162_p2, %p161_p1  ;;  %s146_s29 = ssub.s32 %s628_s22, %s799_s26 }
   0xa   : > { %p482_p6 = scmp.ge.s32.totalorder %s632_s23, 1  ;;  %p149_p7 = scmp.eq.s32.totalorder %s146_s29, 0 }
   0xb   : > { %p715_p8 = por %p168_p5, %p167_p3  ;;  %p211_p9 = scmp.lt.s32.totalorder %s632_s23, 3 }
   0xc   : > { %s721_s6 = scalar_select %p149_p7, %s620_s20, %s151_s27  }
   0xd   : > { %p212_p10 = pnand %p482_p6, %p211_p9 }
   0xe   : > { %p244_p11 = scmp.lt.s32.totalorder (!%p212_p10), %s624_s21, 1  ;;  %s240_s27 = sand.u32 (!%p212_p10), 1, %s616_s19  }
   0xf   : > { %215 = sbr.rel (%p212_p10) target bundleno = 373 (0x175), region = 40  ;;  %s483_s29 = sshll.u32 (!%p212_p10), %s240_s27, 4 }
  0x10   : > { %s242_s7 = scalar_lea.vmem (!%p212_p10), [#allocation2], %s483_s29  ;;  %s495_s9 = sshll.u32 (!%p212_p10), %s624_s21, 8 }
  0x11   : > { %s402_s8 = sshll.u32 (!%p212_p10), %s242_s7, 4  ;;  %s400_s12 = scalar_lea.hbm (!%p212_p10), %s790_s5, %s495_s9  ;;  %s742_s8 = int_to_ptr.vmem [resolvable:$true] %s402_s8 }
  0x14   : > { %v255_v0 = vld [vmem:[%s786_s1] sm:$0xf]  ;;  %v634_v1 = vmov 0   ;;  %v635_v4 = vmov 0.0   ;;  %v636_v5 = vmov 839922192   ;;  %v266_v7 = vlaneseq }
  0x15   : > { %554 = vset.pattern.permute.xlu0 %v634_v1  ;;  %555 = vset.pattern.permute.xlu1 %v634_v1  ;;  %v257_v2 = vld [vmem:[%s788_s3] sm:$0xf]  ;;  %v264_v6 = vunpack.c.l.s4 %v636_v5  ;;  %s245_s13 = scalar_select %p244_p11, %s624_s21, 1  ;;  %vm307_vm1 = vcmask 1043456   ;;  %vm303_vm2 = vcmask 31744  }
  0x16   : > { %261 = vperm.xlu0 %554, %v255_v0   ;;  %288 = vperm.xlu1 %555, %v257_v2   ;;  %v256_v3 = vld [vmem:[%s787_s2] sm:$0xf]  ;;  %v267_v9 = vshrl.u32 %v266_v7, 7  ;;  %s637_s21 = smov [#allocation2]  }
  0x17   : > { %376 = vmatprep.mubr.f32.mxu0 %v635_v4  ;;  %v265_v8 = vunpack.c.0.s8 %v264_v6  ;;  %s494_s14 = sshll.u32 %s245_s13, 3  ;;  %v254_v25 = vld [vmem:[%s789_s4] sm:$0xff]  ;;  %s386_s13 = scalar_lea.sflag [#allocation3], %s240_s27 }
  0x18   : > { %s251_s17 = scalar_lea.vmem %s785_s0, %s494_s14  ;;  %s556_s14 = scalar_lea.vmem %s742_s8, 256 }
  0x19   : > { %v268_v10 = vsub.s32 %v265_v8, %v267_v9  ;;  %v258_v13 = vld [vmem:[%s251_s17] sm:$0xff]  ;;  %p557_p12 = scmp.ne.s32.totalorder %s742_s8, %s556_s14  ;;  %s560_s15 = sshll.u32 %s637_s21, 4  ;;  %s561_s15 = int_to_ptr.vmem [resolvable:$false] %s560_s15 }
  0x1a   : > { %274 = vperm.xlu0 %554, %v256_v3   ;;  %s562_s16 = scalar_lea.vmem %s561_s15, 512  ;;  %p563_p1 = scmp.lt.s32.totalorder %s742_s8, %s561_s15 }
  0x1b   : > { %p558_p13 = pnand %p557_p12, %p708_p4  ;;  %p564_p2 = scmp.lt.s32.totalorder %s562_s16, %s556_s14 }
  0x1d   : > { %p559_p0 = pneg %p558_p13  ;;  %p565_p3 = por %p564_p2, %p563_p1 }
  0x1f   : > { %p566_p5 = pnand %p565_p3, %p559_p0 }
  0x91   : > { %v262_v11 = vpop.permute.xlu0 %261  ;;  %v289_v18 = vpop.permute.xlu1 %288 }
  0x92   : > { %v269_v12 = vrot.slane %v262_v11, %v268_v10 }
  0x94   : > { %v271_v15 = vmul.f32 %v269_v12, %v258_v13 }
  0x95   : > { %v275_v14 = vpop.permute.xlu0 %274 }
  0x96   : > { %v282_v16 = vrot.slane %v275_v14, %v268_v10 }
  0x98   : > { %v284_v17 = vadd.f32 %v282_v16, %v271_v15 }
  0x9a   : > { %v292_v19 = vcombine.high %v284_v17, %v284_v17  ;;  %v294_v20 = vmul.f32 %v289_v18, %v284_v17  ;;  %vm285_vm0 = vcmp.gt.f32.partialorder %v284_v17, 0.0 }
  0x9c   : > { %v295_v21 = vmul.f32 %v292_v19, %v289_v18 }
  0x9e   : > { %v298_v22 = vcombine.low %v294_v20, %v295_v21 }
  0xa0   : > { %v300_v23 = vsel %vm285_vm0, %v284_v17, %v298_v22 }
  0xa1   : > { %v302_v24 = vcombine.high %v300_v23, %v300_v23 }
  0xa3   : > { %486 = vmatprep.subr.msk.mxu0 %vm307_vm1, %v302_v24 }
  0xa4   : > { %487 = vmatpush1.msk.msra.mxu0 %vm307_vm1, %v300_v23 }
  0xa5   : > { %488 = vmatmul.mubr.msk.f32.vlgmr.msra.gmra.mxu0 %vm303_vm2, %v254_v25 }
 0x165   : > { %v378_v26 = vpop.f32.mrf.mxu0 }
 0x166   : > { %383 = vst [vmem:[%s242_s7] sm:$0xff] %v378_v26 }
 0x167   : > { %v380_v27 = vpop.f32.mrf.mxu0 }
 0x168   : > { %384 = vst [vmem:[%s242_s7 + $0x8] sm:$0xff] %v380_v27 }
 0x169   : > { %569 = shalt.err (!%p566_p5)
}
 0x16a   : > { %s570_s17 = scalar_lea.hbm %s400_s12, 256  ;;  %s574_s27 = scalar_lea.hbm %s790_s5, 512 }
 0x16b   : > { %p571_p6 = scmp.ne.s32.totalorder %s400_s12, %s570_s17  ;;  %p575_p10 = scmp.lt.s32.totalorder %s400_s12, %s790_s5 }
 0x16c   : > { %p576_p11 = scmp.lt.s32.totalorder %s574_s27, %s570_s17 }
 0x16d   : > { %p572_p7 = pnand %p571_p6, %p708_p4 }
 0x16e   : > { %p577_p12 = por %p576_p11, %p575_p10 }
 0x16f   : > { %p573_p9 = pneg %p572_p7 }
 0x171   : > { %p578_p13 = pnand %p577_p12, %p573_p9 }
 0x173   : > { %581 = shalt.err (!%p578_p13)
}
 0x174   : > { %496 = dma.vmem_to_hbm [thread:$0]  (%p708_p4), %s742_s8, 256, %s400_s12, %s386_s13  }
 0x175 PF: > { %p502_p0 = scmp.ge.s32.totalorder %s632_s23, 2  ;;  %s414_s9 = sand.u32 1, %s612_s18  }
 0x176   : > { %s415_s10 = scalar_lea.sflag [#allocation3], %s414_s9 }
 0x177   : > { %p499_p1 = pnand %p502_p0, %p715_p8 }
 0x179   : > { %p500_p2 = pneg %p499_p1 }
 0x17b   : > { %607 = dma.done.wait (%p500_p2), %s415_s10, 256  }
 0x17c   : > { %609 = vsyncadd (%p500_p2), %s415_s10, 4294967040  ;;  %s18_s23 = sadd.s32 1, %s632_s23   ;;  %s793_s18 = smov %s616_s19 }
 0x17d   : > { %p15_p3 = scmp.ge.s32.totalorder %s18_s23, 4   ;;  %s794_s19 = smov %s620_s20 }
 0x17e   : > { %s795_s20 = smov %s721_s6  ;;  %s796_s21 = smov %s628_s22 }
 0x17f   : > { %s797_s22 = smov %s799_s26  ;;  %17 = sbr.rel (!%p15_p3) target bundleno = 4 (0x4), region = 75 }
 0x184   :  { %420 = vsyncpa [#allocation3], 1 }
 0x185   :  { %422 = vsyncpa [#allocation3 + $0x1], 1 }

</bundles_post_ra>
